<compile_context>
chip_gen: v7x
topology: tpu7x:2x2x1
jax: 0.10.0
libtpu: 0.0.40
codegen_flags: <defaults>
</compile_context>

<pallas_src>
import jax
import jax.numpy as jnp
import numpy as np
from jax.experimental import pallas as pl
from jax.experimental.pallas import tpu as pltpu

PAD_VAL = -999
N_TYPES = 8
N_CONTRIBS = 5
CONTRIB_SCALES = (1.0, 250.0, 45.0, 35.0, 500.0)
OUT_W = 8  # narrow lane-width output; real contribs live in lanes 0..4


def _head_kernel(x_ref, t_ref, tid_ref,
                 wpre_ref, bpre_ref,
                 wt_ref, bt_ref,
                 w1_ref, sw1_ref, b1_ref,
                 w2_ref, b2_ref,
                 o_ref):
    x = x_ref[...]                                     # (TM, d_in) bf16
    t = t_ref[...]                                     # (TM, 1)    i32

    # Hoisted per-tile masks.
    valid = t != PAD_VAL                               # (TM, 1) bool
    sel = (t == tid_ref[...]).astype(jnp.float32)      # (TM, 8*d_in) 0/1

    # --- preproc: Linear(d_in, d_ff) + ReLU --------------------------------
    x_hid = jnp.maximum(
        jnp.dot(x, wpre_ref[...], preferred_element_type=jnp.float32)
        + bpre_ref[...], 0.0)                          # (TM, d_ff) f32

    # --- fused per-type residual branch (one matmul, masked in place) ------
    y_sel = jnp.maximum(
        jnp.dot(x_hid.astype(jnp.bfloat16), wt_ref[...],
                preferred_element_type=jnp.float32)
        + bt_ref[...], 0.0) * sel                      # (TM, 8*d_in) f32

    # --- fused ContribsNet hidden layer ------------------------------------
    # sum_mat (chunk-sum) is pre-folded into sw1 = tile(w1, 8); residual join
    # (x + x_types) @ w1 == x @ w1 + y_sel @ sw1.
    h = jnp.maximum(
        jnp.dot(x, w1_ref[...], preferred_element_type=jnp.float32)
        + jnp.dot(y_sel.astype(jnp.bfloat16), sw1_ref[...],
                  preferred_element_type=jnp.float32)
        + b1_ref[...], 0.0)                            # (TM, ffc_pad) f32

    # --- final heads + 1/scale + "last column = total" folded into w2 ------
    out = jnp.dot(h.astype(jnp.bfloat16), w2_ref[...],
                  preferred_element_type=jnp.float32) + b2_ref[...]  # (TM, 8)

    o_ref[...] = jnp.where(valid, out, 0.0)


def my_custom_head(x, sc_types, params, *, tm=2048):
    """Pallas wrapper. x: (..., d_input) f32, sc_types: (...) int32.

    Returns (N, 5) with rows whose sc_type == PAD_VAL zeroed (PyTorch drops
    them via boolean compaction, which needs a dynamic shape).
    """
    (wpre, bpre, wt, bt, w1c, b1c, w2c, b2c) = params
    d_in = x.shape[-1]
    d_ff = wpre.shape[-1]
    d_ffc = w1c.shape[-1]

    xf = x.reshape(-1, d_in).astype(jnp.bfloat16)
    tf = sc_types.reshape(-1, 1).astype(jnp.int32)
    n = xf.shape[0]

    # ---- fuse / pad weights (layout plumbing, done outside the kernel) ----
    wt_cat = jnp.transpose(wt, (1, 0, 2)).reshape(d_ff, N_TYPES * d_in)
    bt_cat = bt.reshape(1, N_TYPES * d_in).astype(jnp.float32)
    type_ids = jnp.repeat(jnp.arange(N_TYPES, dtype=jnp.int32),
                          d_in).reshape(1, N_TYPES * d_in)

    ffc = N_CONTRIBS * d_ffc
    ffc_pad = max(128, ((ffc + 127) // 128) * 128)
    w1_cat = jnp.transpose(w1c, (1, 0, 2)).reshape(d_in, ffc)
    w1_cat = jnp.pad(w1_cat, ((0, 0), (0, ffc_pad - ffc)))
    b1_cat = jnp.pad(b1c.reshape(1, ffc),
                     ((0, 0), (0, ffc_pad - ffc))).astype(jnp.float32)
    # sum_mat (= tile(eye(d_in), (8,1))) folded into the contrib weight.
    sum_w1 = jnp.tile(w1_cat, (N_TYPES, 1))           # (8*d_in, ffc_pad)

    scales = jnp.asarray(CONTRIB_SCALES, jnp.float32)
    w2_scaled = w2c.reshape(N_CONTRIBS, d_ffc) / scales[:, None]
    b2_scaled = b2c.reshape(N_CONTRIBS) / scales
    w2_out = jnp.zeros((ffc_pad, OUT_W), jnp.float32)
    for k in range(N_CONTRIBS - 1):
        w2_out = w2_out.at[k * d_ffc:(k + 1) * d_ffc, k].set(w2_scaled[k])
    for k in range(N_CONTRIBS):  # last real column = total over all 5 heads
        w2_out = w2_out.at[k * d_ffc:(k + 1) * d_ffc, N_CONTRIBS - 1].add(
            w2_scaled[k])
    b2_out = jnp.zeros((1, OUT_W), jnp.float32)
    b2_out = b2_out.at[0, :N_CONTRIBS - 1].set(b2_scaled[:N_CONTRIBS - 1])
    b2_out = b2_out.at[0, N_CONTRIBS - 1].set(jnp.sum(b2_scaled))

    # bf16 matmul operands (biases stay f32; accumulation is f32 in-kernel).
    wpre_bf = wpre.astype(jnp.bfloat16)
    bpre_f = bpre.reshape(1, d_ff).astype(jnp.float32)
    wt_bf = wt_cat.astype(jnp.bfloat16)
    w1_bf = w1_cat.astype(jnp.bfloat16)
    sw1_bf = sum_w1.astype(jnp.bfloat16)
    w2_bf = w2_out.astype(jnp.bfloat16)

    # ---- row tiling (pad N up to a multiple of TM; TM multiple of 16) -----
    tm_eff = min(tm, max(16, ((n + 15) // 16) * 16))
    num_tiles = (n + tm_eff - 1) // tm_eff
    n_pad = num_tiles * tm_eff
    if n_pad != n:
        xf = jnp.pad(xf, ((0, n_pad - n), (0, 0)))
        tf = jnp.pad(tf, ((0, n_pad - n), (0, 0)), constant_values=PAD_VAL)

    full = lambda a: pl.BlockSpec(a.shape, lambda i, nd=a.ndim: (0,) * nd)

    flops = 2 * n_pad * (d_in * d_ff
                         + d_ff * (N_TYPES * d_in)
                         + d_in * ffc_pad
                         + (N_TYPES * d_in) * ffc_pad
                         + ffc_pad * OUT_W)
    weight_arrays = (wpre_bf, bpre_f, wt_bf, bt_cat, type_ids,
                     w1_bf, sw1_bf, b1_cat, w2_bf, b2_out)
    weight_bytes = int(sum(int(a.size) * a.dtype.itemsize
                           for a in weight_arrays))
    bytes_accessed = n_pad * (d_in * 2 + 4 + OUT_W * 4) + weight_bytes

    out = pl.pallas_call(
        _head_kernel,
        out_shape=jax.ShapeDtypeStruct((n_pad, OUT_W), jnp.float32),
        grid_spec=pltpu.PrefetchScalarGridSpec(
            num_scalar_prefetch=0,
            grid=(num_tiles,),
            in_specs=[
                pl.BlockSpec((tm_eff, d_in), lambda i: (i, 0)),   # x (bf16)
                pl.BlockSpec((tm_eff, 1), lambda i: (i, 0)),      # sc_types
                full(type_ids),
                full(wpre_bf), full(bpre_f),
                full(wt_bf), full(bt_cat),
                full(w1_bf), full(sw1_bf), full(b1_cat),
                full(w2_bf), full(b2_out),
            ],
            out_specs=pl.BlockSpec((tm_eff, OUT_W), lambda i: (i, 0)),
        ),
        compiler_params=pltpu.CompilerParams(
            dimension_semantics=("parallel",),
            vmem_limit_bytes=48 * 1024 * 1024),
        cost_estimate=pl.CostEstimate(flops=flops, transcendentals=0,
                                      bytes_accessed=bytes_accessed),
    )(xf, tf, type_ids, wpre_bf, bpre_f, wt_bf, bt_cat,
      w1_bf, sw1_bf, b1_cat, w2_bf, b2_out)

    return out[:n, :N_CONTRIBS]


def init_params(key, d_input, d_ff, d_ff_contribs):
    ks = jax.random.split(key, 8)
    u = lambda k, shape, s: jax.random.uniform(k, shape, jnp.float32, -s, s)
    wpre = u(ks[0], (d_input, d_ff), 0.2)
    bpre = u(ks[1], (1, d_ff), 0.1)
    wt = u(ks[2], (N_TYPES, d_ff, d_input), 0.2)
    bt = u(ks[3], (N_TYPES, 1, d_input), 0.1)
    w1c = u(ks[4], (N_CONTRIBS, d_input, d_ff_contribs), 0.2)
    b1c = u(ks[5], (N_CONTRIBS, 1, d_ff_contribs), 0.1)
    w2c = u(ks[6], (N_CONTRIBS, 1, d_ff_contribs), 0.2)   # Linear(d_ffc, 1)
    b2c = u(ks[7], (N_CONTRIBS, 1, 1), 0.1)
    return (wpre, bpre, wt, bt, w1c, b1c, w2c, b2c)


def ref_forward(x, sc_types, params):
    """Pure-numpy f32 reference mirroring the PyTorch forward (with compaction)."""
    (wpre, bpre, wt, bt, w1c, b1c, w2c, b2c) = [np.asarray(p) for p in params]
    xf = np.asarray(x).reshape(-1, x.shape[-1]).astype(np.float32)
    tf = np.asarray(sc_types).reshape(-1)
    mask = tf != PAD_VAL
    xv, tv = xf[mask], tf[mask]
    x_hid = np.maximum(xv @ wpre + bpre, 0.0)
    x_types = np.zeros_like(xv)
    for i in range(N_TYPES):
        idx = tv == i
        if np.any(idx):
            x_types[idx] = np.maximum(x_hid[idx] @ wt[i] + bt[i], 0.0)
    xs = xv + x_types
    ys = []
    for k in range(N_CONTRIBS):
        h = np.maximum(xs @ w1c[k] + b1c[k], 0.0)
        c = np.sum(h * w2c[k], axis=-1, keepdims=True) + b2c[k]
        ys.append(c / CONTRIB_SCALES[k])
    ys = np.concatenate(ys, axis=-1)
    out = np.concatenate([ys[:, :N_CONTRIBS - 1],
                          ys.sum(axis=-1, keepdims=True)], axis=-1)
    return out, mask


if __name__ == "__main__":
    d_input, d_ff, d_ff_contribs = 32, 64, 16
    B, S = 2, 8                       # N = 16 rows after flattening

    key = jax.random.PRNGKey(0)
    kx, kt, kp = jax.random.split(key, 3)

    x = jax.random.normal(kx, (B, S, d_input), jnp.float32)
    sc_types = jax.random.randint(kt, (B, S), 0, N_TYPES).astype(jnp.int32)
    # mark a couple of positions as padding
    sc_types = sc_types.at[0, 0].set(PAD_VAL).at[1, 7].set(PAD_VAL)

    params = init_params(kp, d_input, d_ff, d_ff_contribs)

    out = my_custom_head(x, sc_types, params)
    out = jax.block_until_ready(out)

    ref, mask = ref_forward(x, sc_types, params)
    got = np.asarray(out)
    # bf16 matmul operands (f32 accumulation) -> relaxed tolerance vs f32 ref.
    np.testing.assert_allclose(got[mask], ref, rtol=5e-2, atol=1e-2)
    # padded rows must be zeroed
    assert np.all(got[~mask] == 0.0)

    print("KERNEL_OK")
</pallas_src>

<mosaic_0001>
module attributes {stable_mosaic.version = 11 : i64} {
  func.func @_head_kernel(%arg0: i32, %arg1: memref<16x32xbf16, #tpu.memory_space<vmem>>, %arg2: memref<16x1xi32, #tpu.memory_space<vmem>>, %arg3: memref<1x256xi32, #tpu.memory_space<vmem>>, %arg4: memref<32x64xbf16, #tpu.memory_space<vmem>>, %arg5: memref<1x64xf32, #tpu.memory_space<vmem>>, %arg6: memref<64x256xbf16, #tpu.memory_space<vmem>>, %arg7: memref<1x256xf32, #tpu.memory_space<vmem>>, %arg8: memref<32x128xbf16, #tpu.memory_space<vmem>>, %arg9: memref<256x128xbf16, #tpu.memory_space<vmem>>, %arg10: memref<1x128xf32, #tpu.memory_space<vmem>>, %arg11: memref<128x8xbf16, #tpu.memory_space<vmem>>, %arg12: memref<1x8xf32, #tpu.memory_space<vmem>>, %arg13: memref<16x8xf32, #tpu.memory_space<vmem>>) attributes {dimension_semantics = [#tpu.dimension_semantics<parallel>], iteration_bounds = array<i64: 1>, scalar_prefetch = 0 : i64, scratch_operands = 0 : i64, tpu.core_type = #tpu.core_type<tc>, window_params = [{transform_indices = @transform_0, window_bounds = array<i64: 16, 32>}, {transform_indices = @transform_1, window_bounds = array<i64: 16, 1>}, {pipeline_mode = #tpu.pipeline_mode<synchronous>, transform_indices = @transform_2, window_bounds = array<i64: 1, 256>}, {pipeline_mode = #tpu.pipeline_mode<synchronous>, transform_indices = @transform_3, window_bounds = array<i64: 32, 64>}, {pipeline_mode = #tpu.pipeline_mode<synchronous>, transform_indices = @transform_4, window_bounds = array<i64: 1, 64>}, {pipeline_mode = #tpu.pipeline_mode<synchronous>, transform_indices = @transform_5, window_bounds = array<i64: 64, 256>}, {pipeline_mode = #tpu.pipeline_mode<synchronous>, transform_indices = @transform_6, window_bounds = array<i64: 1, 256>}, {pipeline_mode = #tpu.pipeline_mode<synchronous>, transform_indices = @transform_7, window_bounds = array<i64: 32, 128>}, {pipeline_mode = #tpu.pipeline_mode<synchronous>, transform_indices = @transform_8, window_bounds = array<i64: 256, 128>}, {pipeline_mode = #tpu.pipeline_mode<synchronous>, transform_indices = @transform_9, window_bounds = array<i64: 1, 128>}, {pipeline_mode = #tpu.pipeline_mode<synchronous>, transform_indices = @transform_10, window_bounds = array<i64: 128, 8>}, {pipeline_mode = #tpu.pipeline_mode<synchronous>, transform_indices = @transform_11, window_bounds = array<i64: 1, 8>}, {transform_indices = @transform_12, window_bounds = array<i64: 16, 8>}]} {
    %c0 = arith.constant 0 : index
    %c0_0 = arith.constant 0 : index
    %0 = vector.load %arg1[%c0, %c0_0] : memref<16x32xbf16, #tpu.memory_space<vmem>>, vector<16x32xbf16>
    %c0_1 = arith.constant 0 : index
    %c0_2 = arith.constant 0 : index
    %1 = vector.load %arg2[%c0_1, %c0_2] : memref<16x1xi32, #tpu.memory_space<vmem>>, vector<16x1xi32>
    %c-999_i32 = arith.constant -999 : i32
    %2 = vector.broadcast %c-999_i32 : i32 to vector<16x1xi32>
    %3 = arith.cmpi ne, %1, %2 : vector<16x1xi32>
    %c0_3 = arith.constant 0 : index
    %c0_4 = arith.constant 0 : index
    %4 = vector.load %arg3[%c0_3, %c0_4] : memref<1x256xi32, #tpu.memory_space<vmem>>, vector<1x256xi32>
    %5 = vector.broadcast %1 : vector<16x1xi32> to vector<16x256xi32>
    %6 = vector.broadcast %4 : vector<1x256xi32> to vector<16x256xi32>
    %7 = arith.cmpi eq, %5, %6 : vector<16x256xi32>
    %8 = arith.extui %7 : vector<16x256xi1> to vector<16x256xi32>
    %9 = arith.sitofp %8 : vector<16x256xi32> to vector<16x256xf32>
    %c0_5 = arith.constant 0 : index
    %c0_6 = arith.constant 0 : index
    %10 = vector.load %arg4[%c0_5, %c0_6] : memref<32x64xbf16, #tpu.memory_space<vmem>>, vector<32x64xbf16>
    %cst = arith.constant dense<0.000000e+00> : vector<16x64xf32>
    %11 = tpu.matmul %0, %10, %cst {dimension_numbers = #tpu.dot_dimension_numbers<[1], [0], [0], [1], [0, 0, 1, 1], [], []>} : vector<16x32xbf16>, vector<32x64xbf16>, vector<16x64xf32> -> vector<16x64xf32>
    %c0_7 = arith.constant 0 : index
    %c0_8 = arith.constant 0 : index
    %12 = vector.load %arg5[%c0_7, %c0_8] : memref<1x64xf32, #tpu.memory_space<vmem>>, vector<1x64xf32>
    %13 = vector.broadcast %12 : vector<1x64xf32> to vector<16x64xf32>
    %14 = arith.addf %11, %13 : vector<16x64xf32>
    %cst_9 = arith.constant 0.000000e+00 : f32
    %15 = vector.broadcast %cst_9 : f32 to vector<16x64xf32>
    %16 = arith.maximumf %14, %15 : vector<16x64xf32>
    %17 = arith.truncf %16 : vector<16x64xf32> to vector<16x64xbf16>
    %c0_10 = arith.constant 0 : index
    %c0_11 = arith.constant 0 : index
    %18 = vector.load %arg6[%c0_10, %c0_11] : memref<64x256xbf16, #tpu.memory_space<vmem>>, vector<64x256xbf16>
    %cst_12 = arith.constant dense<0.000000e+00> : vector<16x256xf32>
    %19 = tpu.matmul %17, %18, %cst_12 {dimension_numbers = #tpu.dot_dimension_numbers<[1], [0], [0], [1], [0, 0, 1, 1], [], []>} : vector<16x64xbf16>, vector<64x256xbf16>, vector<16x256xf32> -> vector<16x256xf32>
    %c0_13 = arith.constant 0 : index
    %c0_14 = arith.constant 0 : index
    %20 = vector.load %arg7[%c0_13, %c0_14] : memref<1x256xf32, #tpu.memory_space<vmem>>, vector<1x256xf32>
    %21 = vector.broadcast %20 : vector<1x256xf32> to vector<16x256xf32>
    %22 = arith.addf %19, %21 : vector<16x256xf32>
    %cst_15 = arith.constant 0.000000e+00 : f32
    %23 = vector.broadcast %cst_15 : f32 to vector<16x256xf32>
    %24 = arith.maximumf %22, %23 : vector<16x256xf32>
    %25 = arith.mulf %24, %9 : vector<16x256xf32>
    %c0_16 = arith.constant 0 : index
    %c0_17 = arith.constant 0 : index
    %26 = vector.load %arg8[%c0_16, %c0_17] : memref<32x128xbf16, #tpu.memory_space<vmem>>, vector<32x128xbf16>
    %cst_18 = arith.constant dense<0.000000e+00> : vector<16x128xf32>
    %27 = tpu.matmul %0, %26, %cst_18 {dimension_numbers = #tpu.dot_dimension_numbers<[1], [0], [0], [1], [0, 0, 1, 1], [], []>} : vector<16x32xbf16>, vector<32x128xbf16>, vector<16x128xf32> -> vector<16x128xf32>
    %28 = arith.truncf %25 : vector<16x256xf32> to vector<16x256xbf16>
    %c0_19 = arith.constant 0 : index
    %c0_20 = arith.constant 0 : index
    %29 = vector.load %arg9[%c0_19, %c0_20] : memref<256x128xbf16, #tpu.memory_space<vmem>>, vector<256x128xbf16>
    %cst_21 = arith.constant dense<0.000000e+00> : vector<16x128xf32>
    %30 = tpu.matmul %28, %29, %cst_21 {dimension_numbers = #tpu.dot_dimension_numbers<[1], [0], [0], [1], [0, 0, 1, 1], [], []>} : vector<16x256xbf16>, vector<256x128xbf16>, vector<16x128xf32> -> vector<16x128xf32>
    %31 = arith.addf %27, %30 : vector<16x128xf32>
    %c0_22 = arith.constant 0 : index
    %c0_23 = arith.constant 0 : index
    %32 = vector.load %arg10[%c0_22, %c0_23] : memref<1x128xf32, #tpu.memory_space<vmem>>, vector<1x128xf32>
    %33 = vector.broadcast %32 : vector<1x128xf32> to vector<16x128xf32>
    %34 = arith.addf %31, %33 : vector<16x128xf32>
    %cst_24 = arith.constant 0.000000e+00 : f32
    %35 = vector.broadcast %cst_24 : f32 to vector<16x128xf32>
    %36 = arith.maximumf %34, %35 : vector<16x128xf32>
    %37 = arith.truncf %36 : vector<16x128xf32> to vector<16x128xbf16>
    %c0_25 = arith.constant 0 : index
    %c0_26 = arith.constant 0 : index
    %38 = vector.load %arg11[%c0_25, %c0_26] : memref<128x8xbf16, #tpu.memory_space<vmem>>, vector<128x8xbf16>
    %cst_27 = arith.constant dense<0.000000e+00> : vector<16x8xf32>
    %39 = tpu.matmul %37, %38, %cst_27 {dimension_numbers = #tpu.dot_dimension_numbers<[1], [0], [0], [1], [0, 0, 1, 1], [], []>} : vector<16x128xbf16>, vector<128x8xbf16>, vector<16x8xf32> -> vector<16x8xf32>
    %c0_28 = arith.constant 0 : index
    %c0_29 = arith.constant 0 : index
    %40 = vector.load %arg12[%c0_28, %c0_29] : memref<1x8xf32, #tpu.memory_space<vmem>>, vector<1x8xf32>
    %41 = vector.broadcast %40 : vector<1x8xf32> to vector<16x8xf32>
    %42 = arith.addf %39, %41 : vector<16x8xf32>
    %cst_30 = arith.constant 0.000000e+00 : f32
    %43 = vector.shape_cast %3 : vector<16x1xi1> to vector<16x1xi1>
    %44 = vector.broadcast %43 : vector<16x1xi1> to vector<16x8xi1>
    %45 = vector.broadcast %cst_30 : f32 to vector<16x8xf32>
    %46 = arith.select %44, %42, %45 : vector<16x8xi1>, vector<16x8xf32>
    %c0_31 = arith.constant 0 : index
    %c0_32 = arith.constant 0 : index
    %47 = vector.load %arg13[%c0_31, %c0_32] : memref<16x8xf32, #tpu.memory_space<vmem>>, vector<16x8xf32>
    tpu.vector_store %arg13[%c0_31, %c0_32], %46 {strides = array<i32>} : memref<16x8xf32, #tpu.memory_space<vmem>>, vector<16x8xf32>,
    return
  }
  func.func @transform_0(%arg0: i32) -> (i32, i32) {
    %c0_i32 = arith.constant 0 : i32
    %c0_i32_0 = arith.constant 0 : i32
    return %arg0, %c0_i32 : i32, i32
  }
  func.func @transform_1(%arg0: i32) -> (i32, i32) {
    %c0_i32 = arith.constant 0 : i32
    %c0_i32_0 = arith.constant 0 : i32
    return %arg0, %c0_i32 : i32, i32
  }
  func.func @transform_2(%arg0: i32) -> (i32, i32) {
    %c0_i32 = arith.constant 0 : i32
    %c0_i32_0 = arith.constant 0 : i32
    %c0_i32_1 = arith.constant 0 : i32
    return %c0_i32, %c0_i32_0 : i32, i32
  }
  func.func @transform_3(%arg0: i32) -> (i32, i32) {
    %c0_i32 = arith.constant 0 : i32
    %c0_i32_0 = arith.constant 0 : i32
    %c0_i32_1 = arith.constant 0 : i32
    return %c0_i32, %c0_i32_0 : i32, i32
  }
  func.func @transform_4(%arg0: i32) -> (i32, i32) {
    %c0_i32 = arith.constant 0 : i32
    %c0_i32_0 = arith.constant 0 : i32
    %c0_i32_1 = arith.constant 0 : i32
    return %c0_i32, %c0_i32_0 : i32, i32
  }
  func.func @transform_5(%arg0: i32) -> (i32, i32) {
    %c0_i32 = arith.constant 0 : i32
    %c0_i32_0 = arith.constant 0 : i32
    %c0_i32_1 = arith.constant 0 : i32
    return %c0_i32, %c0_i32_0 : i32, i32
  }
  func.func @transform_6(%arg0: i32) -> (i32, i32) {
    %c0_i32 = arith.constant 0 : i32
    %c0_i32_0 = arith.constant 0 : i32
    %c0_i32_1 = arith.constant 0 : i32
    return %c0_i32, %c0_i32_0 : i32, i32
  }
  func.func @transform_7(%arg0: i32) -> (i32, i32) {
    %c0_i32 = arith.constant 0 : i32
    %c0_i32_0 = arith.constant 0 : i32
    %c0_i32_1 = arith.constant 0 : i32
    return %c0_i32, %c0_i32_0 : i32, i32
  }
  func.func @transform_8(%arg0: i32) -> (i32, i32) {
    %c0_i32 = arith.constant 0 : i32
    %c0_i32_0 = arith.constant 0 : i32
    %c0_i32_1 = arith.constant 0 : i32
    return %c0_i32, %c0_i32_0 : i32, i32
  }
  func.func @transform_9(%arg0: i32) -> (i32, i32) {
    %c0_i32 = arith.constant 0 : i32
    %c0_i32_0 = arith.constant 0 : i32
    %c0_i32_1 = arith.constant 0 : i32
    return %c0_i32, %c0_i32_0 : i32, i32
  }
  func.func @transform_10(%arg0: i32) -> (i32, i32) {
    %c0_i32 = arith.constant 0 : i32
    %c0_i32_0 = arith.constant 0 : i32
    %c0_i32_1 = arith.constant 0 : i32
    return %c0_i32, %c0_i32_0 : i32, i32
  }
  func.func @transform_11(%arg0: i32) -> (i32, i32) {
    %c0_i32 = arith.constant 0 : i32
    %c0_i32_0 = arith.constant 0 : i32
    %c0_i32_1 = arith.constant 0 : i32
    return %c0_i32, %c0_i32_0 : i32, i32
  }
  func.func @transform_12(%arg0: i32) -> (i32, i32) {
    %c0_i32 = arith.constant 0 : i32
    %c0_i32_0 = arith.constant 0 : i32
    return %arg0, %c0_i32 : i32, i32
  }
}

</mosaic_0001>

<bundles_post_ra>
// kernel: tpu_custom_call.1
= control target key start
LH: loop header
LB: loop body
LE: loop exit
PB: predicated region body
PF: predicated region fallthrough
CT: control target
= control target key end

     0   :  { %17 = vsyncpa [#allocation3], 0  ;;  %s1109_s0 = inlined_call_operand.hbm [shape: bf16[16,32], index: 0, kind: input, shape index: {}]   ;;  %s1110_s1 = inlined_call_operand.vmem [shape: s32[16,1], index: 1, kind: input, shape index: {}]   ;;  %s1111_s2 = inlined_call_operand.vmem [shape: s32[1,256], index: 2, kind: input, shape index: {}]   ;;  %s1112_s3 = inlined_call_operand.vmem [shape: bf16[32,64], index: 3, kind: input, shape index: {}]   ;;  %s1113_s4 = inlined_call_operand.vmem [shape: f32[1,64], index: 4, kind: input, shape index: {}]   ;;  %s1114_s5 = inlined_call_operand.vmem [shape: bf16[64,256], index: 5, kind: input, shape index: {}]   ;;  %s1115_s6 = inlined_call_operand.vmem [shape: f32[1,256], index: 6, kind: input, shape index: {}]   ;;  %s1116_s7 = inlined_call_operand.vmem [shape: bf16[32,128], index: 7, kind: input, shape index: {}]   ;;  %s1117_s8 = inlined_call_operand.hbm [shape: bf16[256,128], index: 8, kind: input, shape index: {}]   ;;  %s1118_s9 = inlined_call_operand.vmem [shape: f32[1,128], index: 9, kind: input, shape index: {}]   ;;  %s1119_s10 = inlined_call_operand.vmem [shape: bf16[128,8], index: 10, kind: input, shape index: {}]   ;;  %s1120_s11 = inlined_call_operand.vmem [shape: f32[1,8], index: 11, kind: input, shape index: {}]   ;;  %s1121_s12 = inlined_call_operand.vmem [shape: f32[16,8], index: 12, kind: output, shape index: {}]  }
   0x1   :  { %18 = vsyncpa [#allocation5], 0  ;;  %s885_s21 = smov [#allocation2]   ;;  %s837_s25 = scalar_lea.hbm %s1109_s0, 128 }
   0x2   :  { %s24_s22 = sshll.u32 %s885_s21, 4  ;;  %p838_p0 = scmp.ne.s32.totalorder %s1109_s0, %s837_s25  ;;  %s25_s22 = int_to_ptr.vmem [resolvable:$true] %s24_s22 }
   0x3   :  { %p841_p1 = scmp.lt.u32.totalorder %s837_s25, %s1109_s0 }
   0x5   :  { %p843_p2 = pnand %p841_p1, %p838_p0 }
   0x7   :  { %846 = shalt.err (!%p843_p2)
}
   0x8   :  { %s847_s30 = scalar_lea.vmem %s25_s22, 128  ;;  %p852_p4 = scmp.lt.s32.totalorder %s25_s22, %s25_s22 }
   0x9   :  { %p848_p3 = scmp.ne.s32.totalorder %s25_s22, %s847_s30  ;;  %p853_p5 = scmp.lt.s32.totalorder %s847_s30, %s847_s30 }
   0xb   :  { %p854_p6 = por %p853_p5, %p852_p4 }
   0xd   :  { %p855_p7 = pnand %p854_p6, %p848_p3 }
   0xf   :  { %858 = shalt.err (!%p855_p7)
}
  0x10   :  { %s886_s13 = smov 64   ;;  %s887_s14 = smov 4  }
  0x11   :  { %30 = dma.hbm_to_vmem [thread:$0]  %s1109_s0, 128, %s25_s22, [#allocation3], %s886_s13, %s886_s13, %s887_s14  }
  0x12   :  { %s888_s17 = smov [#allocation4]   ;;  %s859_s21 = scalar_lea.hbm %s1117_s8, 2048 }
  0x13   :  { %s50_s18 = sshll.u32 %s888_s17, 4  ;;  %p860_p8 = scmp.ne.s32.totalorder %s1117_s8, %s859_s21  ;;  %s51_s18 = int_to_ptr.vmem [resolvable:$true] %s50_s18 }
  0x14   :  { %p863_p9 = scmp.lt.u32.totalorder %s859_s21, %s1117_s8 }
  0x16   :  { %p865_p10 = pnand %p863_p9, %p860_p8 }
  0x18   :  { %868 = shalt.err (!%p865_p10)
}
  0x19   :  { %s869_s27 = scalar_lea.vmem %s51_s18, 2048  ;;  %p874_p12 = scmp.lt.s32.totalorder %s51_s18, %s51_s18 }
  0x1a   :  { %p870_p11 = scmp.ne.s32.totalorder %s51_s18, %s869_s27  ;;  %p875_p13 = scmp.lt.s32.totalorder %s869_s27, %s869_s27 }
  0x1c   :  { %p876_p0 = por %p875_p13, %p874_p12 }
  0x1e   :  { %p877_p1 = pnand %p876_p0, %p870_p11 }
  0x20   :  { %880 = shalt.err (!%p877_p1)
}
  0x21   :  { %56 = dma.hbm_to_vmem [thread:$0]  %s1117_s8, 2048, %s51_s18, [#allocation5], %s886_s13, %s886_s13, %s887_s14  }
  0x22   :  { %881 = dma.done.wait [#allocation3], 128  }
  0x23   :  { %882 = vsyncadd [#allocation3], 4294967168 }
  0x24   :  { %883 = dma.done.wait [#allocation5], 2048  }
  0x25   :  { %884 = vsyncadd [#allocation5], 4294965248  ;;  %v889_v0 = vmov 0.0   ;;  %vm890_vm0 = vmmov 0   ;;  %v796_v1 = vld [vmem:[%s1112_s3] sm:$0xff]   ;;  %v797_v2 = vld [vmem:[%s1112_s3 + $0x8] sm:$0xff]   ;;  %v83_v44 = vlaneseq }
  0x26   :  { %751 = vmatprep.subr.bf16.mxu0 %v889_v0  ;;  %755 = vmatprep.mubr.msk.bf16.mxu0 %vm890_vm0, %v889_v0  ;;  %v799_v3 = vld [vmem:[%s1114_s5 + $0x4] ss:$8 sps:$4 sm:$0xff]   ;;  %v801_v4 = vld [vmem:[%s1114_s5] ss:$8 sps:$4 sm:$0xff]   ;;  %v802_v6 = vld [vmem:[%s1114_s5 + $0x14] ss:$8 sps:$4 sm:$0xff]  }
  0x27   :  { %752 = vmatpush3.bf16.msra.mxu0 %v796_v1  ;;  %v997_v5 = vld [vmem:[#allocation2] sm:$0xff]   ;;  %243 = vmatprep.subr.bf16.mxu1 %v799_v3  ;;  %v804_v7 = vld [vmem:[%s1114_s5 + $0x10] ss:$8 sps:$4 sm:$0xff]   ;;  %vm131_vm1 = vcmask 261120   ;;  %v808_v10 = vld [vmem:[%s1114_s5 + $0x34] ss:$8 sps:$4 sm:$0xff]  }
  0x28   :  { %753 = vmatprep.subr.bf16.mxu0 %v889_v0  ;;  %244 = vmatpush1.bf16.msra.mxu1 %v801_v4  ;;  %v805_v8 = vld [vmem:[%s1114_s5 + $0x24] ss:$8 sps:$4 sm:$0xff]   ;;  %v807_v9 = vld [vmem:[%s1114_s5 + $0x20] ss:$8 sps:$4 sm:$0xff]   ;;  %v810_v11 = vld [vmem:[%s1114_s5 + $0x30] ss:$8 sps:$4 sm:$0xff]  }
  0x29   :  { %245 = vmatprep.subr.bf16.mxu1 %v802_v6  ;;  %v891_v12 = vmov 0   ;;  %v1025_v13 = vld [vmem:[%s1110_s1] sm:$0xff]  ;;  %v811_v14 = vld [vmem:[#allocation4 + $0x40] sm:$0xff]   ;;  %v813_v16 = vld [vmem:[#allocation4 + $0x48] sm:$0xff]   ;;  %vm239_vm2 = vcmask 523264   ;;  %v84_v45 = vshrl.u32 %v83_v44, 7 }
  0x2a   :  { %275 = vmatprep.mubr.bf16.mxu1 %v891_v12  ;;  %794 = vset.pattern.permute.xlu0 %v891_v12  ;;  %v812_v15 = vld [vmem:[#allocation4] sm:$0xff]   ;;  %v814_v18 = vld [vmem:[#allocation4 + $0x8] sm:$0xff]   ;;  %v815_v19 = vld [vmem:[#allocation4 + $0x50] sm:$0xff]   ;;  %vm74_vm7 = vcmp.ne.s32.totalorder %v1025_v13, 4294966297  ;;  %vm658_vm9 = vcmask 64512  }
  0x2b   :  { %754 = vmatpush3.bf16.msra.mxu0 %v797_v2  ;;  %795 = vset.pattern.permute.xlu1 %v891_v12  ;;  %v1032_v17 = vld [vmem:[%s1110_s1 + $0x8] sm:$0xff]  ;;  %v816_v20 = vld [vmem:[#allocation4 + $0x10] sm:$0xff]   ;;  %v817_v21 = vld [vmem:[#allocation4 + $0x58] sm:$0xff]   ;;  %v85_v46 = vsub.s32 0, %v84_v45  ;;  %v89_v48 = vsub.s32 1, %v84_v45 }
  0x2c   :  { %246 = vmatpush1.bf16.msra.mxu1 %v804_v7  ;;  %78 = vperm.xlu0 %794, %v1025_v13   ;;  %v818_v22 = vld [vmem:[#allocation4 + $0x18] sm:$0xff]   ;;  %v819_v23 = vld [vmem:[#allocation4 + $0x60] sm:$0xff]   ;;  %v821_v35 = vld [vmem:[#allocation4 + $0x68] sm:$0xff]   ;;  %vm75_vm8 = vcmp.ne.s32.totalorder %v1032_v17, 4294966297 }
  0x2d   :  { %247 = vmatprep.subr.bf16.mxu1 %v805_v8  ;;  %717 = vmatprep.subr.bf16.mxu0 %v811_v14  ;;  %v820_v24 = vld [vmem:[#allocation4 + $0x20] sm:$0xff]   ;;  %v671_v25 = vld [vmem:[%s1113_s4] ss:$0 sm:$0xff]  ;;  %v822_v36 = vld [vmem:[#allocation4 + $0x28] sm:$0xff]  }
  0x2e   :  { %756 = vmatmul.mubr.msk.bf16.vlgmr.msra.gmra.mrb[0].mxu0 %vm131_vm1, %v997_v5  ;;  %v823_v37 = vld [vmem:[#allocation4 + $0x70] sm:$0xff]   ;;  %v825_v39 = vld [vmem:[#allocation4 + $0x78] sm:$0xff]   ;;  %v830_v42 = vld [vmem:[%s1119_s10 + $0x8] sm:$0xff]  }
  0x2f   :  { %718 = vmatpush3.bf16.msra.mxu0 %v812_v15  ;;  %v824_v38 = vld [vmem:[#allocation4 + $0x30] sm:$0xff]   ;;  %v826_v40 = vld [vmem:[#allocation4 + $0x38] sm:$0xff]   ;;  %v831_v43 = vld [vmem:[%s1119_s10 + $0x10] sm:$0xff]  }
  0x30   :  { %248 = vmatpush1.bf16.msra.mxu1 %v807_v9  ;;  %719 = vmatprep.subr.bf16.mxu0 %v813_v16  ;;  %v829_v41 = vld [vmem:[%s1119_s10] sm:$0xff]  }
  0x31   :  { %249 = vmatprep.subr.bf16.mxu1 %v808_v10  ;;  %81 = vperm.xlu0 %794, %v1032_v17   ;;  %v76_v47 = vld [vmem:[%s1111_s2] sm:$0x3] }
  0x32   :  { %v187_v50 = vld [vmem:[%s1115_s6] sm:$0x3]  ;;  %v86_v51 = vrot.slane %v76_v47, %v85_v46  ;;  %v90_v54 = vrot.slane %v76_v47, %v89_v48 }
  0x33   :  { %720 = vmatpush3.bf16.msra.mxu0 %v814_v18  ;;  %v192_v52 = vrot.slane %v187_v50, %v85_v46  ;;  %v196_v53 = vrot.slane %v187_v50, %v89_v48 }
  0x34   :  { %250 = vmatpush1.bf16.msra.mxu1 %v810_v11  ;;  %721 = vmatprep.subr.bf16.mxu0 %v815_v19  ;;  %v827_v19 = vld [vmem:[%s1116_s7] sm:$0xff]  }
  0x35   :  { %767 = vmatprep.subr.bf16.mxu1 %v889_v0 }
  0x37   :  { %722 = vmatpush3.bf16.msra.mxu0 %v816_v20  ;;  %v828_v20 = vld [vmem:[%s1116_s7 + $0x8] sm:$0xff]  }
  0x38   :  { %723 = vmatprep.subr.bf16.mxu0 %v817_v21  ;;  %v832_v21 = vld [vmem:[%s1119_s10 + $0x18] sm:$0xff]  }
  0x3b   :  { %724 = vmatpush3.bf16.msra.mxu0 %v818_v22  ;;  %v833_v22 = vld [vmem:[%s1119_s10 + $0x20] sm:$0xff]  }
  0x3c   :  { %725 = vmatprep.subr.bf16.mxu0 %v819_v23  ;;  %v834_v23 = vld [vmem:[%s1119_s10 + $0x28] sm:$0xff]  }
  0x3f   :  { %726 = vmatpush3.bf16.msra.mxu0 %v820_v24  ;;  %v836_v24 = vld [vmem:[%s1119_s10 + $0x38] sm:$0xff]  }
  0x40   :  { %727 = vmatprep.subr.bf16.mxu0 %v821_v35 }
  0x43   :  { %728 = vmatpush3.bf16.msra.mxu0 %v822_v36 }
  0x44   :  { %729 = vmatprep.subr.bf16.mxu0 %v823_v37 }
  0x47   :  { %730 = vmatpush3.bf16.msra.mxu0 %v824_v38 }
  0x48   :  { %731 = vmatprep.subr.bf16.mxu0 %v825_v39 }
  0x4b   :  { %732 = vmatpush3.bf16.msra.mxu0 %v826_v40 }
  0x4c   :  { %759 = vmatprep.subr.bf16.mxu0 %v889_v0 }
  0xab   :  { %v79_v49 = vpop.permute.xlu0 %78 }
  0xac   :  { %vm91_vm3 = vcmp.eq.s32.totalorder %v79_v49, %v86_v51  ;;  %vm92_vm4 = vcmp.eq.s32.totalorder %v79_v49, %v90_v54 }
  0xad   :  { %v667_v1 = vsel %vm91_vm3, 1.0, %v889_v0  ;;  %v668_v8 = vsel %vm92_vm4, 1.0, %v889_v0 }
  0xb0   :  { %v82_v56 = vpop.permute.xlu0 %81 }
  0xb1   :  { %vm93_vm5 = vcmp.eq.s32.totalorder %v82_v56, %v86_v51  ;;  %vm94_vm6 = vcmp.eq.s32.totalorder %v82_v56, %v90_v54 }
  0xb2   :  { %v669_v6 = vsel %vm93_vm5, 1.0, %v889_v0  ;;  %v670_v10 = vsel %vm94_vm6, 1.0, %v889_v0 }
 0x101   :  { %v169_v26 = vpop.f32.mrb[0].mxu0 }
 0x102   :  { %v170_v27 = vadd.f32 %v671_v25, %v169_v26  ;;  %v757_v28 = vpop.f32.mrb[1].mxu0  ;;  %v647_v26 = vsel %vm75_vm8, 1, %v891_v12 }
 0x103   :  { %v172_v29 = vpop.f32.mrb[2].mxu0 }
 0x104   :  { %v173_v30 = vadd.f32 %v671_v25, %v172_v29  ;;  %v758_v31 = vpop.f32.mrb[3].mxu0  ;;  %v176_v32 = vmax.f32 %v170_v27, 0.0  ;;  %v646_v25 = vsel %vm74_vm7, 1, %v891_v12 }
 0x105   :  { %649 = vperm.xlu1 %795, %v646_v25  }
 0x106   :  { %v177_v33 = vmax.f32 %v173_v30, 0.0 }
 0x108   :  { %v178_v34 = vpack.c.bf16 %v177_v33, %v176_v32  ;;  %v704_v33 = vld [vmem:[%s1118_s9] ss:$0 sm:$0xff] }
 0x109   :  { %652 = vperm.xlu1 %795, %v647_v26  }
 0x10a   :  { %684 = vmatmul.mubr.msk.bf16.vlgmr.msra.gmra.mrb[0].mxu1 %vm239_vm2, %v178_v34 }
 0x10b   :  { %783 = vmatprep.mubr.msk.bf16.mxu1 %vm890_vm0, %v889_v0  ;;  %768 = vmatpush3.bf16.msra.mxu1 %v829_v41 }
 0x10c   :  { %769 = vmatprep.subr.bf16.mxu1 %v889_v0 }
 0x10f   :  { %770 = vmatpush3.bf16.msra.mxu1 %v830_v42  ;;  %v705_v42 = vld [vmem:[%s1120_s11] ss:$0 sm:$0xff] }
 0x110   :  { %771 = vmatprep.subr.bf16.mxu1 %v889_v0 }
 0x113   :  { %772 = vmatpush3.bf16.msra.mxu1 %v831_v43 }
 0x114   :  { %773 = vmatprep.subr.bf16.mxu1 %v889_v0 }
 0x117   :  { %774 = vmatpush3.bf16.msra.mxu1 %v832_v21 }
 0x118   :  { %775 = vmatprep.subr.bf16.mxu1 %v889_v0 }
 0x11b   :  { %776 = vmatpush3.bf16.msra.mxu1 %v833_v22 }
 0x11c   :  { %777 = vmatprep.subr.bf16.mxu1 %v889_v0 }
 0x11f   :  { %778 = vmatpush3.bf16.msra.mxu1 %v834_v23 }
 0x120   :  { %779 = vmatprep.subr.bf16.mxu1 %v889_v0 }
 0x184   :  { %v650_v41 = vpop.permute.xlu1 %649 }
 0x185   :  { %vm654_vm10 = vcmp.eq.s32.totalorder %v650_v41, 1 }
 0x188   :  { %v653_v44 = vpop.permute.xlu1 %652 }
 0x189   :  { %vm655_vm11 = vcmp.eq.s32.totalorder %v653_v44, 1 }
 0x1dd   :  { %v277_v55 = vpop.f32.mrb[0].mxu1 }
 0x1de   :  { %v278_v57 = vadd.f32 %v277_v55, %v192_v52  ;;  %v279_v58 = vpop.f32.mrb[1].mxu1 }
 0x1df   :  { %v280_v59 = vadd.f32 %v279_v58, %v196_v53  ;;  %v281_v60 = vpop.f32.mrb[2].mxu1 }
 0x1e0   :  { %v286_v61 = vmax.f32 %v278_v57, 0.0  ;;  %v282_v62 = vadd.f32 %v281_v60, %v192_v52  ;;  %v283_v63 = vpop.f32.mrb[3].mxu1 }
 0x1e1   :  { %v287_v2 = vmax.f32 %v280_v59, 0.0  ;;  %v284_v3 = vadd.f32 %v283_v63, %v196_v53 }
 0x1e2   :  { %v288_v4 = vmax.f32 %v282_v62, 0.0  ;;  %v290_v9 = vmul.f32 %v667_v1, %v286_v61 }
 0x1e3   :  { %v289_v7 = vmax.f32 %v284_v3, 0.0  ;;  %v291_v14 = vmul.f32 %v668_v8, %v287_v2 }
 0x1e4   :  { %v292_v11 = vmul.f32 %v669_v6, %v288_v4 }
 0x1e5   :  { %v293_v15 = vmul.f32 %v670_v10, %v289_v7 }
 0x1e6   :  { %v298_v16 = vpack.c.bf16 %v292_v11, %v290_v9 }
 0x1e7   :  { %v299_v18 = vpack.c.bf16 %v293_v15, %v291_v14 }
 0x1e9   :  { %460 = vmatprep.mubr.bf16.mxu0 %v299_v18 }
 0x1ea   :  { %461 = vmatmul.mubr.bf16.vlgmr.msra.gmra.mrb[4].mxu0 %v298_v16 }
 0x1eb   :  { %760 = vmatpush3.bf16.msra.mxu0 %v827_v19  ;;  %763 = vmatprep.mubr.msk.bf16.mxu0 %vm890_vm0, %v889_v0 }
 0x1ec   :  { %761 = vmatprep.subr.bf16.mxu0 %v889_v0 }
 0x1ef   :  { %762 = vmatpush3.bf16.msra.mxu0 %v828_v20 }
 0x1f2   :  { %764 = vmatmul.mubr.msk.bf16.vlgmr.msra.gmra.mrb[8].mxu0 %vm131_vm1, %v997_v5  ;;  %v835_v5 = vld [vmem:[%s1119_s10 + $0x30] sm:$0xff]  }
 0x1f3   :  { %780 = vmatpush3.bf16.msra.mxu1 %v835_v5 }
 0x1f4   :  { %781 = vmatprep.subr.bf16.mxu1 %v889_v0 }
 0x1f7   :  { %782 = vmatpush3.bf16.msra.mxu1 %v836_v24 }
 0x2bd   :  { %v733_v27 = vpop.f32.mrb[4].mxu0 }
 0x2be   :  { %v734_v28 = vpop.f32.mrb[5].mxu0 }
 0x2bf   :  { %v735_v29 = vadd.f32 %v734_v28, %v733_v27  ;;  %v736_v30 = vpop.f32.mrb[6].mxu0 }
 0x2c0   :  { %v737_v0 = vpop.f32.mrb[7].mxu0 }
 0x2c1   :  { %v738_v31 = vadd.f32 %v737_v0, %v736_v30 }
 0x2c5   :  { %v515_v32 = vpop.f32.mrb[8].mxu0 }
 0x2c6   :  { %v516_v13 = vadd.f32 %v735_v29, %v515_v32  ;;  %v765_v34 = vpop.f32.mrb[9].mxu0 }
 0x2c7   :  { %v518_v17 = vpop.f32.mrb[10].mxu0 }
 0x2c8   :  { %v529_v35 = vadd.f32 %v704_v33, %v516_v13  ;;  %v519_v36 = vadd.f32 %v738_v31, %v518_v17  ;;  %v766_v37 = vpop.f32.mrb[11].mxu0 }
 0x2ca   :  { %v530_v38 = vadd.f32 %v704_v33, %v519_v36  ;;  %v531_v12 = vmax.f32 %v529_v35, 0.0 }
 0x2cc   :  { %v532_v39 = vmax.f32 %v530_v38, 0.0 }
 0x2ce   :  { %v533_v40 = vpack.c.bf16 %v532_v39, %v531_v12 }
 0x2d0   :  { %784 = vmatmul.mubr.bf16.vlgmr.msra.gmra.mrb[4].mxu1 %v533_v40 }
 0x3a3   :  { %v639_v43 = vpop.f32.mrb[4].mxu1 }
 0x3a4   :  { %v640_v45 = vadd.f32 %v705_v42, %v639_v43  ;;  %v785_v46 = vpop.f32.mrb[5].mxu1 }
 0x3a5   :  { %v642_v47 = vpop.f32.mrb[6].mxu1 }
 0x3a6   :  { %v656_v48 = vsel %vm654_vm10, %v640_v45, 0.0  ;;  %v643_v49 = vadd.f32 %v705_v42, %v642_v47  ;;  %v786_v50 = vpop.f32.mrb[7].mxu1 }
 0x3a7   :  { %659 = vst.msk [vmem:[%s1121_s12] sm:$0xff] %vm658_vm9, %v656_v48 }
 0x3a8   :  { %v657_v51 = vsel %vm655_vm11, %v643_v49, 0.0 }
 0x3a9   :  { %660 = vst.msk [vmem:[%s1121_s12 + $0x8] sm:$0xff] %vm658_vm9, %v657_v51 }
 0x3aa   :  { %665 = vsyncpa [#allocation3], 1 }
 0x3ab   :  { %666 = vsyncpa [#allocation5], 1 }

</bundles_post_ra>
